<compile_context>
chip_gen: v7x
topology: tpu7x:2x2x1
jax: 0.10.0
libtpu: 0.0.40
codegen_flags: <defaults>
</compile_context>

<pallas_src>
import functools

import jax
import jax.numpy as jnp
from jax.experimental import pallas as pl
from jax.experimental.pallas import tpu as pltpu


def _cdiv(a: int, b: int) -> int:
    return -(-a // b)


def _round_up(a: int, b: int) -> int:
    return _cdiv(a, b) * b


def aggregation_forward(x, w1, b1, w2, b2, *, tile_n: int = 512, num_splits: int = 2):
    """mean(x * (tanh(x @ w1 + b1) @ w2 + b2), axis=0) as a Pallas TPU kernel."""
    n, f = x.shape
    f_in, a = w1.shape
    assert f_in == f, "w1 must be (in_features, attention_nodes)"

    # Lane-dense padding of the feature / attention axes.
    f_pad = _round_up(f, 128)
    a_pad = _round_up(a, 128)

    # Batch tiling: num_splits-way parallel split (2 TCs on v7x) x reduction tiles.
    rows_per_split = _cdiv(n, num_splits)
    tn = min(tile_n, _round_up(rows_per_split, 8))
    tiles_per_split = _cdiv(rows_per_split, tn)
    n_pad = num_splits * tiles_per_split * tn

    f32 = jnp.float32
    # Zero padding is exact: padded x rows contribute gate*0 = 0 to the sum,
    # padded feature cols of x / rows of w1 are zero, and padded attention cols
    # have b1 = 0 -> tanh(0) = 0 with w2 = 0.
    x_p = jnp.zeros((n_pad, f_pad), f32).at[:n, :f].set(x.astype(f32))
    w1_p = jnp.zeros((f_pad, a_pad), f32).at[:f, :a].set(w1.astype(f32))
    b1_p = jnp.zeros((1, a_pad), f32).at[:, :a].set(b1.reshape(1, a).astype(f32))
    w2_p = jnp.zeros((1, a_pad), f32).at[:, :a].set(w2.reshape(1, a).astype(f32))
    b2_s = jnp.reshape(b2, (1,)).astype(f32)

    inv_n = 1.0 / float(n)

    def kernel(x_ref, w1_ref, b1_ref, w2_ref, b2_ref, out_ref, acc_ref):
        i = pl.program_id(1)

        @pl.when(i == 0)
        def _init():
            acc_ref[...] = jnp.zeros_like(acc_ref)

        x_t = x_ref[...]                                              # (tn, f_pad)

        # Linear1 + tanh (MXU matmul + EUP tanh).
        h = jnp.tanh(
            jnp.dot(x_t, w1_ref[...], preferred_element_type=jnp.float32)
            + b1_ref[...]
        )                                                             # (tn, a_pad)

        # Linear2 (A -> 1) as VPU multiply + cross-lane reduce (avoids a
        # 1-column MXU matmul).
        gate = jnp.sum(h * w2_ref[...], axis=-1, keepdims=True) + b2_ref[0]  # (tn, 1)

        # Fused gate-weighted batch reduction on the MXU:
        #   acc(8, F) += G^T(8, tn) @ x(tn, F),  G = [gate, 0, ..., 0]
        col = jax.lax.broadcasted_iota(jnp.int32, (tn, 8), 1)
        g8 = jnp.where(col == 0, gate, 0.0)                           # (tn, 8)
        acc_ref[...] += jax.lax.dot_general(
            g8, x_t,
            dimension_numbers=(((0,), (0,)), ((), ())),
            preferred_element_type=jnp.float32,
        )                                                             # (8, f_pad)

        @pl.when(i == pl.num_programs(1) - 1)
        def _finalize():
            out_ref[...] = acc_ref[...] * inv_n

    partials = pl.pallas_call(
        kernel,
        out_shape=jax.ShapeDtypeStruct((num_splits * 8, f_pad), jnp.float32),
        grid_spec=pltpu.PrefetchScalarGridSpec(
            num_scalar_prefetch=0,
            grid=(num_splits, tiles_per_split),
            in_specs=[
                # x: streamed tile by tile (Pallas double-buffers the DMA).
                pl.BlockSpec((tn, f_pad),
                             lambda s, i: (s * tiles_per_split + i, 0)),
                # Weights / biases: resident across the whole grid.
                pl.BlockSpec((f_pad, a_pad), lambda s, i: (0, 0)),
                pl.BlockSpec((1, a_pad), lambda s, i: (0, 0)),
                pl.BlockSpec((1, a_pad), lambda s, i: (0, 0)),
                # b2: single scalar in SMEM.
                pl.BlockSpec(memory_space=pltpu.MemorySpace.SMEM),
            ],
            out_specs=pl.BlockSpec((8, f_pad), lambda s, i: (s, 0)),
            scratch_shapes=[pltpu.VMEM((8, f_pad), jnp.float32)],
        ),
        compiler_params=pltpu.CompilerParams(
            dimension_semantics=("parallel", "arbitrary"),
        ),
    )(x_p, w1_p, b1_p, w2_p, b2_s)

    # Row 0 of each split block holds that split's partial (already scaled by
    # 1/N); all other rows are zero, so a plain sum combines the partials.
    return jnp.sum(partials, axis=0)[:f]


if __name__ == "__main__":
    # Small shapes consistent with the module: batch N=8, linear_nodes=16,
    # attention_nodes=16.
    N, LINEAR_NODES, ATTENTION_NODES = 8, 16, 16

    key = jax.random.PRNGKey(0)
    kx, kw1, kb1, kw2, kb2 = jax.random.split(key, 5)

    x = jax.random.normal(kx, (N, LINEAR_NODES), dtype=jnp.float32)

    # Deterministic parameter init (uniform, PyTorch-Linear-like bounds).
    bound1 = 1.0 / (LINEAR_NODES ** 0.5)
    w1 = jax.random.uniform(
        kw1, (LINEAR_NODES, ATTENTION_NODES), jnp.float32, -bound1, bound1
    )
    b1 = jax.random.uniform(kb1, (1, ATTENTION_NODES), jnp.float32, -bound1, bound1)

    bound2 = 1.0 / (ATTENTION_NODES ** 0.5)
    w2 = jax.random.uniform(kw2, (ATTENTION_NODES, 1), jnp.float32, -bound2, bound2)
    b2 = jax.random.uniform(kb2, (1, 1), jnp.float32, -bound2, bound2)

    fwd = jax.jit(functools.partial(aggregation_forward))
    out = fwd(x, w1, b1, w2, b2)
    jax.block_until_ready(out)

    # Pure-JAX reference check.
    gate_ref = jnp.tanh(x @ w1 + b1) @ w2 + b2
    ref = jnp.mean(x * gate_ref, axis=0)
    assert out.shape == ref.shape, (out.shape, ref.shape)
    assert jnp.allclose(out, ref, atol=1e-5, rtol=1e-5), "mismatch vs reference"

    print("KERNEL_OK")
</pallas_src>

<mosaic_0001>
module attributes {stable_mosaic.version = 11 : i64} {
  func.func @kernel(%arg0: i32, %arg1: i32, %arg2: memref<8x128xf32, #tpu.memory_space<vmem>>, %arg3: memref<128x128xf32, #tpu.memory_space<vmem>>, %arg4: memref<1x128xf32, #tpu.memory_space<vmem>>, %arg5: memref<1x128xf32, #tpu.memory_space<vmem>>, %arg6: memref<1xf32, #tpu.memory_space<smem>>, %arg7: memref<8x128xf32, #tpu.memory_space<vmem>>, %arg8: memref<8x128xf32, #tpu.memory_space<vmem>>) attributes {dimension_semantics = [#tpu.dimension_semantics<parallel>, #tpu.dimension_semantics<arbitrary>], iteration_bounds = array<i64: 2, 1>, scalar_prefetch = 0 : i64, scratch_operands = 1 : i64, tpu.core_type = #tpu.core_type<tc>, window_params = [{transform_indices = @transform_0, window_bounds = array<i64: 8, 128>}, {pipeline_mode = #tpu.pipeline_mode<synchronous>, transform_indices = @transform_1, window_bounds = array<i64: 128, 128>}, {pipeline_mode = #tpu.pipeline_mode<synchronous>, transform_indices = @transform_2, window_bounds = array<i64: 1, 128>}, {pipeline_mode = #tpu.pipeline_mode<synchronous>, transform_indices = @transform_3, window_bounds = array<i64: 1, 128>}, {transform_indices = @transform_4, window_bounds = array<i64: 1>}, {transform_indices = @transform_5, window_bounds = array<i64: 8, 128>}]} {
    %c0_i32 = arith.constant 0 : i32
    %0 = arith.cmpi eq, %arg1, %c0_i32 : i32
    %1 = arith.extui %0 : i1 to i32
    %c0_i32_0 = arith.constant 0 : i32
    %2 = arith.cmpi ne, %1, %c0_i32_0 : i32
    scf.if %2 {
      %cst_19 = arith.constant 0.000000e+00 : f32
      %32 = vector.broadcast %cst_19 : f32 to vector<8x128xf32>
      %c0_20 = arith.constant 0 : index
      %c0_21 = arith.constant 0 : index
      %33 = vector.load %arg8[%c0_20, %c0_21] : memref<8x128xf32, #tpu.memory_space<vmem>>, vector<8x128xf32>
      tpu.vector_store %arg8[%c0_20, %c0_21], %32 {strides = array<i32>} : memref<8x128xf32, #tpu.memory_space<vmem>>, vector<8x128xf32>,
    } else {
    }
    %c0 = arith.constant 0 : index
    %c0_1 = arith.constant 0 : index
    %3 = vector.load %arg2[%c0, %c0_1] : memref<8x128xf32, #tpu.memory_space<vmem>>, vector<8x128xf32>
    %c0_2 = arith.constant 0 : index
    %c0_3 = arith.constant 0 : index
    %4 = vector.load %arg3[%c0_2, %c0_3] : memref<128x128xf32, #tpu.memory_space<vmem>>, vector<128x128xf32>
    %cst = arith.constant dense<0.000000e+00> : vector<8x128xf32>
    %5 = tpu.matmul %3, %4, %cst {dimension_numbers = #tpu.dot_dimension_numbers<[1], [0], [0], [1], [0, 0, 1, 1], [], []>} : vector<8x128xf32>, vector<128x128xf32>, vector<8x128xf32> -> vector<8x128xf32>
    %c0_4 = arith.constant 0 : index
    %c0_5 = arith.constant 0 : index
    %6 = vector.load %arg4[%c0_4, %c0_5] : memref<1x128xf32, #tpu.memory_space<vmem>>, vector<1x128xf32>
    %7 = vector.broadcast %6 : vector<1x128xf32> to vector<8x128xf32>
    %8 = arith.addf %5, %7 : vector<8x128xf32>
    %9 = math.tanh %8 : vector<8x128xf32>
    %c0_6 = arith.constant 0 : index
    %c0_7 = arith.constant 0 : index
    %10 = vector.load %arg5[%c0_6, %c0_7] : memref<1x128xf32, #tpu.memory_space<vmem>>, vector<1x128xf32>
    %11 = vector.broadcast %10 : vector<1x128xf32> to vector<8x128xf32>
    %12 = arith.mulf %9, %11 : vector<8x128xf32>
    %cst_8 = arith.constant dense<0.000000e+00> : vector<8xf32>
    %13 = vector.multi_reduction <add>, %12, %cst_8 [1] : vector<8x128xf32> to vector<8xf32>
    %14 = vector.shape_cast %13 : vector<8xf32> to vector<8x1xf32>
    %c0_9 = arith.constant 0 : index
    %15 = memref.load %arg6[%c0_9] : memref<1xf32, #tpu.memory_space<smem>>
    %16 = vector.broadcast %15 : f32 to vector<8x1xf32>
    %17 = arith.addf %14, %16 : vector<8x1xf32>
    %18 = tpu.iota {dimensions = array<i32: 1>} : vector<8x8xi32>
    %c0_i32_10 = arith.constant 0 : i32
    %19 = vector.broadcast %c0_i32_10 : i32 to vector<8x8xi32>
    %20 = arith.cmpi eq, %18, %19 : vector<8x8xi32>
    %cst_11 = arith.constant 0.000000e+00 : f32
    %21 = vector.shape_cast %17 : vector<8x1xf32> to vector<8x1xf32>
    %22 = vector.broadcast %21 : vector<8x1xf32> to vector<8x8xf32>
    %23 = vector.broadcast %cst_11 : f32 to vector<8x8xf32>
    %24 = arith.select %20, %22, %23 : vector<8x8xi1>, vector<8x8xf32>
    %c0_12 = arith.constant 0 : index
    %c0_13 = arith.constant 0 : index
    %25 = vector.load %arg8[%c0_12, %c0_13] : memref<8x128xf32, #tpu.memory_space<vmem>>, vector<8x128xf32>
    %cst_14 = arith.constant dense<0.000000e+00> : vector<8x128xf32>
    %26 = tpu.matmul %24, %3, %cst_14 {dimension_numbers = #tpu.dot_dimension_numbers<[0], [0], [1], [1], [0, 1, 1, 1], [], []>} : vector<8x8xf32>, vector<8x128xf32>, vector<8x128xf32> -> vector<8x128xf32>
    %27 = arith.addf %25, %26 : vector<8x128xf32>
    %c0_15 = arith.constant 0 : index
    %c0_16 = arith.constant 0 : index
    %28 = vector.load %arg8[%c0_15, %c0_16] : memref<8x128xf32, #tpu.memory_space<vmem>>, vector<8x128xf32>
    tpu.vector_store %arg8[%c0_15, %c0_16], %27 {strides = array<i32>} : memref<8x128xf32, #tpu.memory_space<vmem>>, vector<8x128xf32>,
    %c0_i32_17 = arith.constant 0 : i32
    %29 = arith.cmpi eq, %arg1, %c0_i32_17 : i32
    %30 = arith.extui %29 : i1 to i32
    %c0_i32_18 = arith.constant 0 : i32
    %31 = arith.cmpi ne, %30, %c0_i32_18 : i32
    scf.if %31 {
      %c0_19 = arith.constant 0 : index
      %c0_20 = arith.constant 0 : index
      %32 = vector.load %arg8[%c0_19, %c0_20] : memref<8x128xf32, #tpu.memory_space<vmem>>, vector<8x128xf32>
      %cst_21 = arith.constant 1.250000e-01 : f32
      %33 = vector.broadcast %cst_21 : f32 to vector<8x128xf32>
      %34 = arith.mulf %32, %33 : vector<8x128xf32>
      %c0_22 = arith.constant 0 : index
      %c0_23 = arith.constant 0 : index
      %35 = vector.load %arg7[%c0_22, %c0_23] : memref<8x128xf32, #tpu.memory_space<vmem>>, vector<8x128xf32>
      tpu.vector_store %arg7[%c0_22, %c0_23], %34 {strides = array<i32>} : memref<8x128xf32, #tpu.memory_space<vmem>>, vector<8x128xf32>,
    } else {
    }
    return
  }
  func.func @transform_0(%arg0: i32, %arg1: i32) -> (i32, i32) {
    %c1_i32 = arith.constant 1 : i32
    %0 = arith.muli %arg0, %c1_i32 : i32
    %1 = arith.addi %0, %arg1 : i32
    %c0_i32 = arith.constant 0 : i32
    %c0_i32_0 = arith.constant 0 : i32
    return %1, %c0_i32 : i32, i32
  }
  func.func @transform_1(%arg0: i32, %arg1: i32) -> (i32, i32) {
    %c0_i32 = arith.constant 0 : i32
    %c0_i32_0 = arith.constant 0 : i32
    %c0_i32_1 = arith.constant 0 : i32
    return %c0_i32, %c0_i32_0 : i32, i32
  }
  func.func @transform_2(%arg0: i32, %arg1: i32) -> (i32, i32) {
    %c0_i32 = arith.constant 0 : i32
    %c0_i32_0 = arith.constant 0 : i32
    %c0_i32_1 = arith.constant 0 : i32
    return %c0_i32, %c0_i32_0 : i32, i32
  }
  func.func @transform_3(%arg0: i32, %arg1: i32) -> (i32, i32) {
    %c0_i32 = arith.constant 0 : i32
    %c0_i32_0 = arith.constant 0 : i32
    %c0_i32_1 = arith.constant 0 : i32
    return %c0_i32, %c0_i32_0 : i32, i32
  }
  func.func @transform_4(%arg0: i32, %arg1: i32) -> i32 {
    %c0_i32 = arith.constant 0 : i32
    %c0_i32_0 = arith.constant 0 : i32
    return %c0_i32 : i32
  }
  func.func @transform_5(%arg0: i32, %arg1: i32) -> (i32, i32) {
    %c0_i32 = arith.constant 0 : i32
    %c0_i32_0 = arith.constant 0 : i32
    return %arg0, %c0_i32 : i32, i32
  }
}

</mosaic_0001>

<bundles_post_ra>
// kernel: aggregation_forward.1
= control target key start
LH: loop header
LB: loop body
LE: loop exit
PB: predicated region body
PF: predicated region fallthrough
CT: control target
= control target key end

     0   :  { %s717_s20 = smov 0   ;;  %s719_s21 = smov 0   ;;  %s811_s0 = inlined_call_operand.vmem [shape: f32[16,128], index: 0, kind: input, shape index: {}]   ;;  %s812_s1 = inlined_call_operand.vmem [shape: f32[128,128], index: 1, kind: input, shape index: {}]   ;;  %s813_s2 = inlined_call_operand.vmem [shape: f32[1,128], index: 2, kind: input, shape index: {}]   ;;  %s814_s3 = inlined_call_operand.vmem [shape: f32[1,128], index: 3, kind: input, shape index: {}]   ;;  %s815_s4 = inlined_call_operand.<no memory space> [shape: f32[1], index: 4, kind: input, shape index: {}]   ;;  %s816_s5 = inlined_call_operand.vmem [shape: f32[16,128], index: 5, kind: output, shape index: {}]  }
   0x1   :  { %10 = sst [smem:[#allocation3]] %s815_s4  ;;  %s721_s22 = smov 0  }
   0x2 LB: > { %s28_s4 = sadd.s32 1, %s675_s21  ;;  %p537_p0 = scmp.ge.s32.totalorder %s679_s22, 1  ;;  %s679_s22 = sphi %s721_s22, %s16_s22   ;;  %s675_s21 = sphi %s719_s21, %s818_s21   ;;  %s671_s20 = sphi %s717_s20, %s817_s20  }
   0x3   : > { %p30_p1 = scmp.ge.s32.totalorder %s28_s4, 2  ;;  %p203_p2 = scmp.lt.s32.totalorder %s679_s22, 3 }
   0x5   : > { %s820_s4 = smov (%p30_p1, %s28_s4), 0  ;;  %p204_p3 = pnand %p537_p0, %p203_p2 }
   0x6   : > { %v246_v0 = vld [vmem:[%s812_s1] sm:$0xff] (!%p204_p3)  ;;  %v247_v1 = vld [vmem:[%s812_s1 + $0x8] sm:$0xff] (!%p204_p3)  ;;  %v248_v2 = vld [vmem:[%s812_s1 + $0x10] sm:$0xff] (!%p204_p3)  ;;  %v681_v3 = vmov (!%p204_p3), 0.0|0.0   ;;  %vm682_vm0 = vmmov (!%p204_p3), 0   ;;  %v683_v6 = vmov (!%p204_p3), 0.0   ;;  %v353_v34 = vlaneseq (!%p204_p3) }
   0x7   : > { %207 = sbr.rel (%p204_p3) target bundleno = 756 (0x2f4), region = 40  ;;  %604 = vmatprep.subr.bf16.mxu0 (!%p204_p3), %v681_v3  ;;  %v605_v4 = vpack.c.bf16 (!%p204_p3), %v247_v1, %v246_v0  ;;  %v249_v5 = vld [vmem:[%s812_s1 + $0x18] sm:$0xff] (!%p204_p3)  ;;  %596 = vmatprep.mubr.msk.f32.mxu0 (!%p204_p3), %vm682_vm0, %v683_v6  ;;  %p231_p4 = scmp.lt.s32.totalorder (!%p204_p3), %s671_s20, 1  ;;  %v250_v8 = vld [vmem:[%s812_s1 + $0x20] sm:$0xff] (!%p204_p3)  ;;  %v251_v9 = vld [vmem:[%s812_s1 + $0x28] sm:$0xff] (!%p204_p3)  ;;  %vm390_vm2 = vcmask (!%p204_p3), 64512  }
   0x8   : > { %599 = vmatprep.subr.mxu1 (!%p204_p3), %v683_v6  ;;  %601 = vmatprep.mubr.msk.f32.mxu1 (!%p204_p3), %vm682_vm0, %v683_v6  ;;  %v608_v7 = vpack.c.bf16 (!%p204_p3), %v249_v5, %v248_v2  ;;  %v611_v10 = vpack.c.bf16 (!%p204_p3), %v251_v9, %v250_v8  ;;  %v252_v12 = vld [vmem:[%s812_s1 + $0x30] sm:$0xff] (!%p204_p3)  ;;  %v253_v13 = vld [vmem:[%s812_s1 + $0x38] sm:$0xff] (!%p204_p3)  ;;  %v254_v15 = vld [vmem:[%s812_s1 + $0x40] sm:$0xff] (!%p204_p3)  ;;  %s350_s17 = sld [smem:[#allocation3]] (!%p204_p3)  ;;  %v354_v35 = vand.u32 (!%p204_p3), 127, %v353_v34 }
   0x9   : > { %606 = vmatpush3.bf16.msra.mxu0 (!%p204_p3), %v605_v4  ;;  %v614_v14 = vpack.c.bf16 (!%p204_p3), %v253_v13, %v252_v12  ;;  %v255_v16 = vld [vmem:[%s812_s1 + $0x48] sm:$0xff] (!%p204_p3)  ;;  %v256_v18 = vld [vmem:[%s812_s1 + $0x50] sm:$0xff] (!%p204_p3)  ;;  %v257_v19 = vld [vmem:[%s812_s1 + $0x58] sm:$0xff] (!%p204_p3) }
   0xa   : > { %607 = vmatprep.subr.bf16.mxu0 (!%p204_p3), %v681_v3  ;;  %v617_v17 = vpack.c.bf16 (!%p204_p3), %v255_v16, %v254_v15  ;;  %v620_v20 = vpack.c.bf16 (!%p204_p3), %v257_v19, %v256_v18  ;;  %v258_v21 = vld [vmem:[%s812_s1 + $0x60] sm:$0xff] (!%p204_p3)  ;;  %v259_v22 = vld [vmem:[%s812_s1 + $0x68] sm:$0xff] (!%p204_p3)  ;;  %v260_v24 = vld [vmem:[%s812_s1 + $0x70] sm:$0xff] (!%p204_p3)  ;;  %vm355_vm1 = vcmp.eq.s32.totalorder (!%p204_p3), %v354_v35, 0 }
   0xb   : > { %v623_v23 = vpack.c.bf16 (!%p204_p3), %v259_v22, %v258_v21  ;;  %v261_v25 = vld [vmem:[%s812_s1 + $0x78] sm:$0xff] (!%p204_p3)  ;;  %v540_v27 = vld [vmem:[%s813_s2] ss:$0 sm:$0xff] (!%p204_p3) }
   0xc   : > { %v626_v26 = vpack.c.bf16 (!%p204_p3), %v261_v25, %v260_v24  ;;  %v541_v31 = vld [vmem:[%s814_s3] ss:$0 sm:$0xff] (!%p204_p3) }
   0xd   : > { %609 = vmatpush3.bf16.msra.mxu0 (!%p204_p3), %v608_v7 }
   0xe   : > { %s822_s20 = smov (!%p231_p4, %s671_s20), 1  ;;  %610 = vmatprep.subr.bf16.mxu0 %v681_v3  ;;  %v351_v36 = vstv %s350_s17 }
   0xf   : > { %s538_s10 = sshll.u32 %s822_s20, 3 }
  0x10   : > { %s234_s13 = scalar_lea.vmem %s811_s0, %s538_s10  ;;  %s239_s23 = scalar_lea.vmem %s816_s5, %s538_s10 }
  0x11   : > { %v245_v11 = vld [vmem:[%s234_s13] sm:$0xff]  ;;  %612 = vmatpush3.bf16.msra.mxu0 %v611_v10 }
  0x12   : > { %600 = vmatpush3.msra.mxu1 %v245_v11  ;;  %613 = vmatprep.subr.bf16.mxu0 %v681_v3 }
  0x15   : > { %615 = vmatpush3.bf16.msra.mxu0 %v614_v14 }
  0x16   : > { %616 = vmatprep.subr.bf16.mxu0 %v681_v3 }
  0x19   : > { %618 = vmatpush3.bf16.msra.mxu0 %v617_v17 }
  0x1a   : > { %619 = vmatprep.subr.bf16.mxu0 %v681_v3 }
  0x1d   : > { %621 = vmatpush3.bf16.msra.mxu0 %v620_v20 }
  0x1e   : > { %622 = vmatprep.subr.bf16.mxu0 %v681_v3 }
  0x21   : > { %624 = vmatpush3.bf16.msra.mxu0 %v623_v23 }
  0x22   : > { %625 = vmatprep.subr.bf16.mxu0 %v681_v3 }
  0x25   : > { %627 = vmatpush3.bf16.msra.mxu0 %v626_v26 }
  0x28   : > { %597 = vmatmul.mubr.f32.vlgmr.msra.gmra.mrb[0].mxu0 %v245_v11 }
  0xfb   : > { %v335_v28 = vpop.f32.mrb[0].mxu0 }
  0xfc   : > { %v336_v29 = vadd.f32 %v540_v27, %v335_v28  ;;  %v598_v30 = vpop.f32.mrb[1].mxu0 }
  0xfe   : > { %655 = vtanh.f32 %v336_v29 }
 0x108   : > { %v656_v32 = vpop.eup %655 }
 0x109   : > { %v347_v33 = vmul.f32 %v656_v32, %v541_v31 }
 0x10b   : > { %348 = vadd.xlane.f32.xlu0 %v347_v33 }
 0x198   : > { %v349_v37 = vpop.xlane.xlu0 %348 }
 0x199   : > { %v352_v38 = vadd.f32 %v351_v36, %v349_v37 }
 0x19b   : > { %v356_v39 = vsel %vm355_vm1, %v352_v38, 0.0 }
 0x19c   : > { %358 = vxpose.xlu0.b32.start.end [1/1] (short) (narrow) %v356_v39, 8 }
 0x21c   : > { %v374_v40 = vpop.trf.xlu0 }
 0x21d   : > { %602 = vmatmul.mubr.msk.f32.vlgmr.msra.gmra.mrb[0].mxu1 %vm390_vm2, %v374_v40 }
 0x2f0   : > { %v460_v41 = vpop.f32.mrb[0].mxu1 }
 0x2f1   : > { %v470_v42 = vmul.f32 0.125, %v460_v41  ;;  %v603_v43 = vpop.f32.mrb[1].mxu1 }
 0x2f3   : > { %471 = vst [vmem:[%s239_s23] sm:$0xff] %v470_v42 }
 0x2f4 PF: > { %s16_s22 = sadd.s32 1, %s679_s22   ;;  %s817_s20 = smov %s675_s21 }
 0x2f5   : > { %p13_p5 = scmp.ge.s32.totalorder %s16_s22, 4   ;;  %s818_s21 = smov %s820_s4 }
 0x2f7   :  { %15 = sbr.rel (!%p13_p5) target bundleno = 2 (0x2), region = 78 }

</bundles_post_ra>
